<compile_context>
chip_gen: v5e
topology: v5e:2x2
jax: 0.10.0
libtpu: 0.0.40
codegen_flags: <defaults>
</compile_context>

<pallas_src>
import functools

import jax
import jax.numpy as jnp
from jax import lax
from jax.experimental import pallas as pl
from jax.experimental.pallas import tpu as pltpu


# ---------------------------------------------------------------------------
# Tiling / VMEM helpers
# ---------------------------------------------------------------------------
def _round_up(n, m):
    return ((n + m - 1) // m) * m


def _sublane(dtype):
    return {4: 8, 2: 16, 1: 32}.get(jnp.dtype(dtype).itemsize, 8)


def _row_tile(rows, row_tile, dtype):
    """Sublane-aligned row tile; guarantees >=2 row blocks when possible (v7x)."""
    sub = _sublane(dtype)
    tr = min(row_tile, _round_up(rows, sub))
    tr = max(sub, (tr // sub) * sub)
    if pl.cdiv(rows, tr) < 2 and rows > sub:
        tr = max(sub, _round_up(pl.cdiv(rows, 2), sub))
    return tr


def _n_tile(d_out, n_tile):
    """Lane-aligned N tile; prefer 256-multiples for the 256-wide MXU."""
    if d_out % 128 != 0:
        return d_out  # full-width block (allowed when it equals the array dim)
    t = max(128, (min(n_tile, d_out) // 128) * 128)
    if d_out % 256 == 0 and t < d_out:
        t = max(256, (t // 256) * 256)
    return t


def _vmem_limit(required_bytes):
    """Generation-aware scoped-VMEM limit from actual tile bytes."""
    try:
        cap = pltpu.get_tpu_info().vmem_capacity_bytes
    except Exception:
        cap = 64 * 1024 * 1024
    # 25% slack over computed tiles, floor 16 MiB, leave ~1/8 of VMEM headroom.
    return int(min(max(required_bytes * 5 // 4, 16 * 1024 * 1024), cap * 7 // 8))


# ---------------------------------------------------------------------------
# Kernels
# ---------------------------------------------------------------------------
def _ln_rows_f32(x, gamma, beta, eps):
    """Two-pass LayerNorm over the last axis of a row tile, f32 math."""
    xf = x.astype(jnp.float32)
    mean = jnp.mean(xf, axis=-1, keepdims=True)
    xc = xf - mean
    var = jnp.mean(xc * xc, axis=-1, keepdims=True)
    inv_std = lax.rsqrt(var + eps)
    return xc * (inv_std * gamma.astype(jnp.float32)) + beta.astype(jnp.float32)


def _layernorm_kernel(x_ref, gamma_ref, beta_ref, o_ref, *, eps):
    o_ref[...] = _ln_rows_f32(x_ref[...], gamma_ref[...], beta_ref[...], eps
                              ).astype(o_ref.dtype)


def _prenorm_linear_kernel(x_ref, gamma_ref, beta_ref, w_ref, b_ref, o_ref,
                           y_ref, *, eps):
    """Fused LayerNorm + dense.  Grid = (row_tiles, n_tiles).

    The normalized row tile is computed once per row tile (j == 0) into a VMEM
    scratch in the MXU feed dtype (bf16) and reused for every N tile of W.
    """
    @pl.when(pl.program_id(1) == 0)
    def _():
        y_ref[...] = _ln_rows_f32(x_ref[...], gamma_ref[...], beta_ref[...],
                                  eps).astype(y_ref.dtype)

    acc = jnp.dot(y_ref[...], w_ref[...], preferred_element_type=jnp.float32)
    o_ref[...] = (acc + b_ref[...].astype(jnp.float32)).astype(o_ref.dtype)


# ---------------------------------------------------------------------------
# Wrappers
# ---------------------------------------------------------------------------
def layer_norm(x, gamma, beta, *, eps=1e-5, row_tile=1024, out_dtype=None):
    """nn.LayerNorm(embed_dim) forward. x: (..., D); gamma/beta: (D,)."""
    orig_shape = x.shape
    D = orig_shape[-1]
    out_dtype = out_dtype or x.dtype
    x2 = x.reshape(-1, D)
    rows = x2.shape[0]
    tr = _row_tile(rows, row_tile, x.dtype)
    nr = pl.cdiv(rows, tr)

    gamma2 = gamma.reshape(1, D)
    beta2 = beta.reshape(1, D)

    xb = jnp.dtype(x.dtype).itemsize
    ob = jnp.dtype(out_dtype).itemsize
    need = (2 * tr * D * xb       # x blocks (double buffered)
            + 2 * tr * D * ob     # out blocks
            + 4 * D * 4           # gamma/beta
            + 2 * tr * D * 4)     # f32 intermediates headroom

    out = pl.pallas_call(
        functools.partial(_layernorm_kernel, eps=eps),
        out_shape=jax.ShapeDtypeStruct((rows, D), out_dtype),
        grid_spec=pltpu.PrefetchScalarGridSpec(
            num_scalar_prefetch=0,
            grid=(nr,),
            in_specs=[
                pl.BlockSpec((tr, D), lambda i: (i, 0)),   # x row tiles stream
                pl.BlockSpec((1, D), lambda i: (0, 0)),    # gamma resident
                pl.BlockSpec((1, D), lambda i: (0, 0)),    # beta resident
            ],
            out_specs=pl.BlockSpec((tr, D), lambda i: (i, 0)),
        ),
        compiler_params=pltpu.CompilerParams(
            dimension_semantics=("parallel",),
            vmem_limit_bytes=_vmem_limit(need),
        ),
    )(x2, gamma2, beta2)
    return out.reshape(orig_shape[:-1] + (D,))


def pre_norm_linear(x, gamma, beta, w, b, *, eps=1e-5, row_tile=512, n_tile=512,
                    mxu_dtype=jnp.bfloat16, out_dtype=None):
    """Fused PreNorm with a linear `fn`: x -> LayerNorm -> x @ W + b.

    W is fed to the MXU in `mxu_dtype` (bf16 by default: full-rate on every TPU
    generation); accumulation is f32.  D_out is tiled so the W block stays a
    few MiB even at real model dims (v7x: 64 MiB VMEM).
    """
    orig_shape = x.shape
    D = orig_shape[-1]
    D_out = w.shape[-1]
    out_dtype = out_dtype or x.dtype
    x2 = x.reshape(-1, D)
    rows = x2.shape[0]
    tr = _row_tile(rows, row_tile, x.dtype)
    tn = _n_tile(D_out, n_tile)
    nr = pl.cdiv(rows, tr)
    nn = pl.cdiv(D_out, tn)

    gamma2 = gamma.reshape(1, D)
    beta2 = beta.reshape(1, D)
    w_mxu = w.astype(mxu_dtype)                      # bf16 MXU feed
    b2 = b.reshape(1, D_out).astype(jnp.float32)

    xb = jnp.dtype(x.dtype).itemsize
    mb = jnp.dtype(mxu_dtype).itemsize
    ob = jnp.dtype(out_dtype).itemsize
    need = (2 * tr * D * xb       # x blocks
            + 2 * D * tn * mb     # W blocks
            + 2 * tr * tn * ob    # out blocks
            + tr * D * mb         # y scratch
            + 4 * D * 4           # gamma/beta
            + 2 * tn * 4          # bias
            + 2 * tr * D * 4)     # f32 LN intermediates headroom

    out = pl.pallas_call(
        functools.partial(_prenorm_linear_kernel, eps=eps),
        out_shape=jax.ShapeDtypeStruct((rows, D_out), out_dtype),
        grid_spec=pltpu.PrefetchScalarGridSpec(
            num_scalar_prefetch=0,
            grid=(nr, nn),
            in_specs=[
                pl.BlockSpec((tr, D), lambda i, j: (i, 0)),   # x row tiles
                pl.BlockSpec((1, D), lambda i, j: (0, 0)),    # gamma resident
                pl.BlockSpec((1, D), lambda i, j: (0, 0)),    # beta resident
                pl.BlockSpec((D, tn), lambda i, j: (0, j)),   # W N-tiles
                pl.BlockSpec((1, tn), lambda i, j: (0, j)),   # bias N-tiles
            ],
            out_specs=pl.BlockSpec((tr, tn), lambda i, j: (i, j)),
            scratch_shapes=[pltpu.VMEM((tr, D), mxu_dtype)],  # normalized rows
        ),
        compiler_params=pltpu.CompilerParams(
            dimension_semantics=("parallel", "arbitrary"),
            vmem_limit_bytes=_vmem_limit(need),
        ),
    )(x2, gamma2, beta2, w_mxu, b2)
    return out.reshape(orig_shape[:-1] + (D_out,))


def pre_norm(x, fn, gamma, beta, *, eps=1e-5, ln_dtype=None, **kwargs):
    """Generic PreNorm.forward: fn(LayerNorm(x), **kwargs) for arbitrary fn."""
    return fn(layer_norm(x, gamma, beta, eps=eps, out_dtype=ln_dtype), **kwargs)


# ---------------------------------------------------------------------------
# Demo / self-test
# ---------------------------------------------------------------------------
if __name__ == "__main__":
    # embed_dim = 256: lane-dense and a 256-multiple (fills the v6e/v7x MXU).
    batch, seq, embed_dim = 2, 8, 256

    key = jax.random.PRNGKey(0)
    kx, kw, kr = jax.random.split(key, 3)
    x = jax.random.normal(kx, (batch, seq, embed_dim), dtype=jnp.float32)

    gamma = jnp.ones((embed_dim,), jnp.float32) * 1.1
    beta = jnp.full((embed_dim,), 0.05, jnp.float32)
    w = jax.random.normal(kw, (embed_dim, embed_dim), dtype=jnp.float32) * 0.02
    b_lin = jnp.full((embed_dim,), 0.01, jnp.float32)

    # Fused path (LN + linear in one kernel, bf16 MXU feed, f32 accumulation).
    out_fused = jax.block_until_ready(pre_norm_linear(x, gamma, beta, w, b_lin))
    # Generic path (Pallas LayerNorm kernel, then arbitrary fn in plain JAX).
    out_generic = jax.block_until_ready(
        pre_norm(x, lambda y: y @ w + b_lin, gamma, beta))

    # Pure-JAX reference.
    mean = jnp.mean(x, axis=-1, keepdims=True)
    var = jnp.mean((x - mean) ** 2, axis=-1, keepdims=True)
    ln_ref = (x - mean) / jnp.sqrt(var + 1e-5) * gamma + beta
    ref_f32 = ln_ref @ w + b_lin
    ref_bf16 = jnp.dot(ln_ref.astype(jnp.bfloat16), w.astype(jnp.bfloat16),
                       preferred_element_type=jnp.float32) + b_lin

    assert out_fused.shape == (batch, seq, embed_dim)
    assert out_generic.shape == (batch, seq, embed_dim)
    assert jnp.allclose(out_fused, ref_bf16, atol=1e-2, rtol=1e-2), \
        float(jnp.max(jnp.abs(out_fused - ref_bf16)))
    assert jnp.allclose(out_generic, ref_f32, atol=2e-3, rtol=2e-3), \
        float(jnp.max(jnp.abs(out_generic - ref_f32)))

    # Ragged row count (rows not a multiple of the sublane tile): exercises the
    # pad-free cdiv grid with a partial last row block.
    x_r = jax.random.normal(kr, (3, 7, embed_dim), dtype=jnp.float32)
    ln_r = jax.block_until_ready(layer_norm(x_r, gamma, beta))
    mean_r = jnp.mean(x_r, axis=-1, keepdims=True)
    var_r = jnp.mean((x_r - mean_r) ** 2, axis=-1, keepdims=True)
    ln_r_ref = (x_r - mean_r) / jnp.sqrt(var_r + 1e-5) * gamma + beta
    assert jnp.allclose(ln_r, ln_r_ref, atol=2e-5, rtol=2e-5), \
        float(jnp.max(jnp.abs(ln_r - ln_r_ref)))

    print("KERNEL_OK")
</pallas_src>

<mosaic_0001>
module attributes {stable_mosaic.version = 11 : i64} {
  func.func @_prenorm_linear_kernel(%arg0: i32, %arg1: i32, %arg2: memref<8x256xf32, #tpu.memory_space<vmem>>, %arg3: memref<1x256xf32, #tpu.memory_space<vmem>>, %arg4: memref<1x256xf32, #tpu.memory_space<vmem>>, %arg5: memref<256x256xbf16, #tpu.memory_space<vmem>>, %arg6: memref<1x256xf32, #tpu.memory_space<vmem>>, %arg7: memref<8x256xf32, #tpu.memory_space<vmem>>, %arg8: memref<8x256xbf16, #tpu.memory_space<vmem>>) attributes {dimension_semantics = [#tpu.dimension_semantics<parallel>, #tpu.dimension_semantics<arbitrary>], iteration_bounds = array<i64: 2, 1>, scalar_prefetch = 0 : i64, scratch_operands = 1 : i64, tpu.core_type = #tpu.core_type<tc>, window_params = [{transform_indices = @transform_0, window_bounds = array<i64: 8, 256>}, {pipeline_mode = #tpu.pipeline_mode<synchronous>, transform_indices = @transform_1, window_bounds = array<i64: 1, 256>}, {pipeline_mode = #tpu.pipeline_mode<synchronous>, transform_indices = @transform_2, window_bounds = array<i64: 1, 256>}, {transform_indices = @transform_3, window_bounds = array<i64: 256, 256>}, {transform_indices = @transform_4, window_bounds = array<i64: 1, 256>}, {transform_indices = @transform_5, window_bounds = array<i64: 8, 256>}]} {
    %c0_i32 = arith.constant 0 : i32
    %0 = arith.cmpi eq, %arg1, %c0_i32 : i32
    %1 = arith.extui %0 : i1 to i32
    %c0_i32_0 = arith.constant 0 : i32
    %2 = arith.cmpi ne, %1, %c0_i32_0 : i32
    scf.if %2 {
      %c0_8 = arith.constant 0 : index
      %c0_9 = arith.constant 0 : index
      %10 = vector.load %arg2[%c0_8, %c0_9] : memref<8x256xf32, #tpu.memory_space<vmem>>, vector<8x256xf32>
      %c0_10 = arith.constant 0 : index
      %c0_11 = arith.constant 0 : index
      %11 = vector.load %arg3[%c0_10, %c0_11] : memref<1x256xf32, #tpu.memory_space<vmem>>, vector<1x256xf32>
      %c0_12 = arith.constant 0 : index
      %c0_13 = arith.constant 0 : index
      %12 = vector.load %arg4[%c0_12, %c0_13] : memref<1x256xf32, #tpu.memory_space<vmem>>, vector<1x256xf32>
      %cst_14 = arith.constant dense<0.000000e+00> : vector<8xf32>
      %13 = vector.multi_reduction <add>, %10, %cst_14 [1] : vector<8x256xf32> to vector<8xf32>
      %14 = vector.shape_cast %13 : vector<8xf32> to vector<8x1xf32>
      %cst_15 = arith.constant 2.560000e+02 : f32
      %15 = vector.broadcast %cst_15 : f32 to vector<8x1xf32>
      %16 = arith.divf %14, %15 : vector<8x1xf32>
      %17 = vector.broadcast %16 : vector<8x1xf32> to vector<8x256xf32>
      %18 = arith.subf %10, %17 : vector<8x256xf32>
      %19 = arith.mulf %18, %18 : vector<8x256xf32>
      %cst_16 = arith.constant dense<0.000000e+00> : vector<8xf32>
      %20 = vector.multi_reduction <add>, %19, %cst_16 [1] : vector<8x256xf32> to vector<8xf32>
      %21 = vector.shape_cast %20 : vector<8xf32> to vector<8x1xf32>
      %cst_17 = arith.constant 2.560000e+02 : f32
      %22 = vector.broadcast %cst_17 : f32 to vector<8x1xf32>
      %23 = arith.divf %21, %22 : vector<8x1xf32>
      %cst_18 = arith.constant 9.99999974E-6 : f32
      %24 = vector.broadcast %cst_18 : f32 to vector<8x1xf32>
      %25 = arith.addf %23, %24 : vector<8x1xf32>
      %26 = math.rsqrt %25 : vector<8x1xf32>
      %27 = vector.broadcast %26 : vector<8x1xf32> to vector<8x256xf32>
      %28 = vector.broadcast %11 : vector<1x256xf32> to vector<8x256xf32>
      %29 = arith.mulf %27, %28 : vector<8x256xf32>
      %30 = arith.mulf %18, %29 : vector<8x256xf32>
      %31 = vector.broadcast %12 : vector<1x256xf32> to vector<8x256xf32>
      %32 = arith.addf %30, %31 : vector<8x256xf32>
      %33 = arith.truncf %32 : vector<8x256xf32> to vector<8x256xbf16>
      %c0_19 = arith.constant 0 : index
      %c0_20 = arith.constant 0 : index
      %34 = vector.load %arg8[%c0_19, %c0_20] : memref<8x256xbf16, #tpu.memory_space<vmem>>, vector<8x256xbf16>
      tpu.vector_store %arg8[%c0_19, %c0_20], %33 {strides = array<i32>} : memref<8x256xbf16, #tpu.memory_space<vmem>>, vector<8x256xbf16>,
    } else {
    }
    %c0 = arith.constant 0 : index
    %c0_1 = arith.constant 0 : index
    %3 = vector.load %arg8[%c0, %c0_1] : memref<8x256xbf16, #tpu.memory_space<vmem>>, vector<8x256xbf16>
    %c0_2 = arith.constant 0 : index
    %c0_3 = arith.constant 0 : index
    %4 = vector.load %arg5[%c0_2, %c0_3] : memref<256x256xbf16, #tpu.memory_space<vmem>>, vector<256x256xbf16>
    %cst = arith.constant dense<0.000000e+00> : vector<8x256xf32>
    %5 = tpu.matmul %3, %4, %cst {dimension_numbers = #tpu.dot_dimension_numbers<[1], [0], [0], [1], [0, 0, 1, 1], [], []>} : vector<8x256xbf16>, vector<256x256xbf16>, vector<8x256xf32> -> vector<8x256xf32>
    %c0_4 = arith.constant 0 : index
    %c0_5 = arith.constant 0 : index
    %6 = vector.load %arg6[%c0_4, %c0_5] : memref<1x256xf32, #tpu.memory_space<vmem>>, vector<1x256xf32>
    %7 = vector.broadcast %6 : vector<1x256xf32> to vector<8x256xf32>
    %8 = arith.addf %5, %7 : vector<8x256xf32>
    %c0_6 = arith.constant 0 : index
    %c0_7 = arith.constant 0 : index
    %9 = vector.load %arg7[%c0_6, %c0_7] : memref<8x256xf32, #tpu.memory_space<vmem>>, vector<8x256xf32>
    tpu.vector_store %arg7[%c0_6, %c0_7], %8 {strides = array<i32>} : memref<8x256xf32, #tpu.memory_space<vmem>>, vector<8x256xf32>,
    return
  }
  func.func @transform_0(%arg0: i32, %arg1: i32) -> (i32, i32) {
    %c0_i32 = arith.constant 0 : i32
    %c0_i32_0 = arith.constant 0 : i32
    return %arg0, %c0_i32 : i32, i32
  }
  func.func @transform_1(%arg0: i32, %arg1: i32) -> (i32, i32) {
    %c0_i32 = arith.constant 0 : i32
    %c0_i32_0 = arith.constant 0 : i32
    %c0_i32_1 = arith.constant 0 : i32
    return %c0_i32, %c0_i32_0 : i32, i32
  }
  func.func @transform_2(%arg0: i32, %arg1: i32) -> (i32, i32) {
    %c0_i32 = arith.constant 0 : i32
    %c0_i32_0 = arith.constant 0 : i32
    %c0_i32_1 = arith.constant 0 : i32
    return %c0_i32, %c0_i32_0 : i32, i32
  }
  func.func @transform_3(%arg0: i32, %arg1: i32) -> (i32, i32) {
    %c0_i32 = arith.constant 0 : i32
    %c0_i32_0 = arith.constant 0 : i32
    return %c0_i32, %arg1 : i32, i32
  }
  func.func @transform_4(%arg0: i32, %arg1: i32) -> (i32, i32) {
    %c0_i32 = arith.constant 0 : i32
    %c0_i32_0 = arith.constant 0 : i32
    return %c0_i32, %arg1 : i32, i32
  }
  func.func @transform_5(%arg0: i32, %arg1: i32) -> (i32, i32) {
    %c0_i32 = arith.constant 0 : i32
    return %arg0, %arg1 : i32, i32
  }
}

</mosaic_0001>

<bundles_post_ra>
// kernel: tpu_custom_call.1
= control target key start
LH: loop header
LB: loop body
LE: loop exit
PB: predicated region body
PF: predicated region fallthrough
CT: control target
= control target key end

     0   :  { %s1515_s0 = inlined_call_operand.hbm [shape: f32[16,256], index: 0, kind: input, shape index: {}]   ;;  %s1516_s1 = inlined_call_operand.hbm [shape: f32[1,256], index: 1, kind: input, shape index: {}]   ;;  %s1517_s2 = inlined_call_operand.hbm [shape: f32[1,256], index: 2, kind: input, shape index: {}]   ;;  %s1518_s3 = inlined_call_operand.hbm [shape: bf16[256,256], index: 3, kind: input, shape index: {}]   ;;  %s1519_s4 = inlined_call_operand.vmem [shape: f32[1,256], index: 4, kind: input, shape index: {}]   ;;  %s1520_s5 = inlined_call_operand.hbm [shape: f32[16,256], index: 5, kind: output, shape index: {}]  }
   0x1   :  { %1521 = sst [smem:[#allocation16_spill]] %s1516_s1 }
   0x2   :  { %10 = vsyncpa [#allocation4], 0 }
   0x3   :  { %12 = vsyncpa [#allocation4 + $0x1], 0 }
   0x4   :  { %13 = vsyncpa [#allocation7], 0 }
   0x5   :  { %14 = vsyncpa [#allocation10], 0 }
   0x6   :  { %15 = vsyncpa [#allocation5], 0 }
   0x7   :  { %17 = vsyncpa [#allocation5 + $0x1], 0  ;;  %s1323_s18 = smov 0   ;;  %s1325_s19 = smov 0  }
   0x8   :  { %s1327_s20 = smov 0   ;;  %s1329_s21 = smov 0  }
   0x9   :  { %s1331_s22 = smov 0   ;;  %s1333_s23 = smov 0  }
   0xa LB: > { %s791_s24 = sadd.s32 4294967295, %s1285_s23   ;;  %s792_s25 = sadd.s32 4294967294, %s1285_s23   ;;  %s1285_s23 = sphi %s1333_s23, %s23_s23   ;;  %s1281_s22 = sphi %s1331_s22, %s1535_s22   ;;  %s1277_s21 = sphi %s1329_s21, %s1534_s21   ;;  %s1273_s20 = sphi %s1327_s20, %s1533_s20   ;;  %s1269_s19 = sphi %s1325_s19, %s1532_s19   ;;  %s1265_s18 = sphi %s1323_s18, %s1531_s18  }
   0xb   : > { %p55_p0 = scmp.ne.s32.totalorder %s1269_s19, %s1265_s18  ;;  %p1357_p1 = scmp.eq.s32.totalorder %s791_s24, 0 }
   0xc   : > { %p1361_p2 = scmp.eq.s32.totalorder %s791_s24, 1  ;;  %p181_p3 = scmp.eq.s32.totalorder %s792_s25, 1 }
   0xd   : > { %p1367_p4 = por %p1357_p1, %p55_p0  ;;  %p793_p5 = scmp.ge.s32.totalorder %s1285_s23, 1 }
   0xe   : > { %p1372_p6 = por %p181_p3, %p55_p0  ;;  %p188_p7 = scmp.lt.s32.totalorder %s1285_s23, 3 }
   0xf   : > { %s1526_s1 = sld [smem:[#allocation16_spill]]  ;;  %p798_p9 = scmp.ge.s32.totalorder %s1285_s23, 2 }
  0x10   : > { %p1380_p8 = pnand %p793_p5, %p188_p7  ;;  %s1287_s9 = smov [#allocation6]  }
  0x11   : > { %s202_s10 = sshll.u32 %s1287_s9, 4  ;;  %s212_s13 = sshll.u32 %s1517_s2, 4  ;;  %s203_s10 = int_to_ptr.vmem [resolvable:$true] %s202_s10  ;;  %s213_s13 = int_to_ptr.hbm [resolvable:$true] %s212_s13 }
  0x12   : > { %p991_p10 = pneg %p1380_p8  ;;  %s226_s17 = sshll.u32 %s1518_s3, 4  ;;  %s227_s17 = int_to_ptr.hbm [resolvable:$true] %s226_s17 }
  0x13   : > { %s1288_s24 = smov [#allocation8]   ;;  %s1289_s30 = smov [#allocation9]  }
  0x14   : > { %p1392_p11 = pnand %p991_p10, %p1357_p1  ;;  %s214_s25 = sshll.u32 %s1288_s24, 4  ;;  %s215_s25 = int_to_ptr.vmem [resolvable:$true] %s214_s25 }
  0x15   : > { %s200_s7 = sshll.u32 %s1526_s1, 4  ;;  %s228_s6 = sshll.u32 %s1289_s30, 4  ;;  %s201_s7 = int_to_ptr.hbm [resolvable:$true] %s200_s7  ;;  %s229_s6 = int_to_ptr.vmem [resolvable:$true] %s228_s6 }
  0x16   : > { %994 = dma.hbm_to_vmem [thread:$0]  (!%p1392_p11), %s201_s7, 32, %s203_s10, [#allocation7]  }
  0x17   : > { %997 = dma.hbm_to_vmem [thread:$0]  (!%p1392_p11), %s213_s13, 32, %s215_s25, [#allocation7]  }
  0x18   : > { %s1290_s9 = smov 128   ;;  %s1291_s11 = smov 8  }
  0x19   : > { %1000 = dma.hbm_to_vmem [thread:$0]  (!%p1392_p11), %s227_s17, 4096, %s229_s6, [#allocation10], %s1290_s9, %s1290_s9, %s1291_s11  }
  0x1a   : > { %s42_s12 = sadd.s32 1, %s1273_s20  ;;  %s35_s15 = sadd.s32 1, %s1281_s22 }
  0x1b   : > { %p49_p12 = scmp.ne.s32.totalorder %s1273_s20, %s1269_s19  ;;  %p37_p13 = scmp.ge.s32.totalorder %s35_s15, 2 }
  0x1c   : > { %p50_p0 = scmp.eq.s32.totalorder %s1285_s23, 0  ;;  %p1012_p5 = scmp.lt.s32.totalorder %s1285_s23, 2 }
  0x1d   : > { %p1412_p3 = por %p1361_p2, %p49_p12  ;;  %s1537_s15 = smov (%p37_p13, %s35_s15), 0 }
  0x1e   : > { %p1419_p7 = por %p50_p0, %p49_p12  ;;  %s250_s13 = sand.u32 1, %s1273_s20  }
  0x1f   : > { %s39_s14 = ssub.s32 %s1281_s22, %s1537_s15  ;;  %s799_s16 = sshll.u32 %s250_s13, 4 }
  0x20   : > { %p40_p10 = scmp.eq.s32.totalorder %s39_s14, 0  ;;  %s941_s17 = sshll.u32 %s1281_s22, 4 }
  0x21   : > { %s259_s30 = scalar_lea.hbm %s1515_s0, %s941_s17  ;;  %s254_s6 = scalar_lea.vmem [#allocation3], %s799_s16 }
  0x22   : > { %s1428_s27 = scalar_select %p40_p10, %s1273_s20, %s42_s12  }
  0x23   : > { %s263_s9 = sshll.u32 %s254_s6, 4  ;;  %s261_s11 = sshll.u32 %s259_s30, 4  ;;  %s264_s9 = int_to_ptr.vmem [resolvable:$true] %s263_s9  ;;  %s262_s11 = int_to_ptr.hbm [resolvable:$true] %s261_s11 }
  0x24   : > { %p1002_p2 = pnand %p1012_p5, %p1419_p7  ;;  %s251_s1 = scalar_lea.sflag [#allocation4], %s250_s13 }
  0x25   : > { %272 = sbr.rel (%p1380_p8) target bundleno = 465 (0x1d1), region = 40  ;;  %s1440_s12 = sand.u32 (!%p1380_p8), 1, %s1269_s19  }
  0x26   : > { %1004 = dma.hbm_to_vmem [thread:$0]  (!%p1002_p2), %s262_s11, 256, %s264_s9, %s251_s1  }
  0x27   : > { %s803_s14 = sshll.u32 (!%p1380_p8), %s1440_s12, 4  ;;  %s275_s16 = scalar_lea.sflag (!%p1380_p8), [#allocation4], %s1440_s12 }
  0x28   : > { %s278_s17 = scalar_lea.vmem (!%p1380_p8), [#allocation3], %s803_s14 }
  0x2a   : > { %1248 = dma.done.wait (%p1367_p4), %s275_s16, 256  }
  0x2b   : > { %1250 = vsyncadd (%p1367_p4), %s275_s16, 4294967040 }
  0x2c   : > { %1252 = dma.done.wait (%p1357_p1), [#allocation7], 64  }
  0x2d   : > { %1254 = vsyncadd (%p1357_p1), [#allocation7], 4294967232 }
  0x2e   : > { %1256 = dma.done.wait (%p1357_p1), [#allocation10], 4096  }
  0x2f   : > { %1258 = vsyncadd (%p1357_p1), [#allocation10], 4294963200  ;;  %v336_v0 = vld [vmem:[%s278_s17] sm:$0xff]  ;;  %v337_v1 = vld [vmem:[%s278_s17 + $0x8] sm:$0xff]  ;;  %v1292_v3 = vmov 256.0   ;;  %s974_s28 = sshll.u32 %s1277_s21, 4 }
  0x30   : > { %v340_v2 = vadd.f32 %v337_v1, %v336_v0  ;;  %1071 = vrcp.f32 %v1292_v3  ;;  %v866_v17 = vld [vmem:[#allocation9 + $0x70] sm:$0xf]  ;;  %v957_v18 = vld [vmem:[#allocation9 + $0x74] sm:$0xf0]  ;;  %v956_v22 = vld [vmem:[#allocation9 + $0x74] sm:$0xf]  ;;  %s662_s13 = scalar_lea.hbm %s1520_s5, %s974_s28 }
  0x31   : > { %v930_v19 = vld [vmem:[#allocation9 + $0xf0] sm:$0xf]  ;;  %v867_v20 = vor.u32 %v957_v18, %v866_v17  ;;  %v973_v21 = vld [vmem:[#allocation9 + $0xf4] sm:$0xf0]  ;;  %v868_v23 = vld [vmem:[#allocation9 + $0x78] sm:$0xf0] }
  0x32   : > { %341 = vadd.xlane.f32.xlu0 %v340_v2  ;;  %v931_v24 = vor.u32 %v973_v21, %v930_v19  ;;  %v871_v25 = vor.u32 %v956_v22, %v868_v23  ;;  %v972_v26 = vld [vmem:[#allocation9 + $0xf4] sm:$0xf]  ;;  %v932_v27 = vld [vmem:[#allocation9 + $0xf8] sm:$0xf0]  ;;  %v858_v29 = vld [vmem:[#allocation9 + $0x60] sm:$0xf] }
  0x33   : > { %594 = vmatpush.bf16.msra.mxu0 %v867_v20  ;;  %v935_v28 = vor.u32 %v972_v26, %v932_v27  ;;  %v955_v30 = vld [vmem:[#allocation9 + $0x64] sm:$0xf0]  ;;  %v922_v31 = vld [vmem:[#allocation9 + $0xe0] sm:$0xf]  ;;  %v954_v34 = vld [vmem:[#allocation9 + $0x64] sm:$0xf] }
  0x34   : > { %607 = vmatpush.bf16.msra.mxu1 %v931_v24  ;;  %620 = vmatpush.bf16.msra.mxu2 %v871_v25  ;;  %v859_v32 = vor.u32 %v955_v30, %v858_v29  ;;  %v971_v33 = vld [vmem:[#allocation9 + $0xe4] sm:$0xf0]  ;;  %v860_v35 = vld [vmem:[#allocation9 + $0x68] sm:$0xf0]  ;;  %v970_v38 = vld [vmem:[#allocation9 + $0xe4] sm:$0xf] }
  0x35   : > { %633 = vmatpush.bf16.msra.mxu3 %v935_v28  ;;  %v923_v36 = vor.u32 %v971_v33, %v922_v31  ;;  %v863_v37 = vor.u32 %v954_v34, %v860_v35  ;;  %v924_v39 = vld [vmem:[#allocation9 + $0xe8] sm:$0xf0]  ;;  %v850_v41 = vld [vmem:[#allocation9 + $0x50] sm:$0xf]  ;;  %v953_v42 = vld [vmem:[#allocation9 + $0x54] sm:$0xf0] }
  0x36   : > { %v1072_v4 = vpop.eup %1071  ;;  %v927_v40 = vor.u32 %v970_v38, %v924_v39  ;;  %v914_v43 = vld [vmem:[#allocation9 + $0xd0] sm:$0xf]  ;;  %v851_v44 = vor.u32 %v953_v42, %v850_v41  ;;  %v969_v45 = vld [vmem:[#allocation9 + $0xd4] sm:$0xf0]  ;;  %v952_v46 = vld [vmem:[#allocation9 + $0x54] sm:$0xf] }
  0x37   : > { %v344_v5 = vmul.f32 256.0, %v1072_v4  ;;  %vm348_vm0 = vweird.f32 %v1072_v4  ;;  %595 = vmatpush.bf16.msra.mxu0 %v859_v32  ;;  %v852_v47 = vld [vmem:[#allocation9 + $0x58] sm:$0xf0]  ;;  %v915_v48 = vor.u32 %v969_v45, %v914_v43  ;;  %v968_v50 = vld [vmem:[#allocation9 + $0xd4] sm:$0xf]  ;;  %s324_s24 = scalar_lea.vmem [#allocation11], %s803_s14 }
  0x38   : > { %608 = vmatpush.bf16.msra.mxu1 %v923_v36  ;;  %621 = vmatpush.bf16.msra.mxu2 %v863_v37  ;;  %v855_v49 = vor.u32 %v952_v46, %v852_v47  ;;  %v916_v51 = vld [vmem:[#allocation9 + $0xd8] sm:$0xf0]  ;;  %v842_v53 = vld [vmem:[#allocation9 + $0x40] sm:$0xf]  ;;  %v951_v54 = vld [vmem:[#allocation9 + $0x44] sm:$0xf0] }
  0x39   : > { %v345_v6 = vsub.f32 1.0, %v344_v5  ;;  %634 = vmatpush.bf16.msra.mxu3 %v927_v40  ;;  %v919_v52 = vor.u32 %v968_v50, %v916_v51  ;;  %v906_v55 = vld [vmem:[#allocation9 + $0xc0] sm:$0xf]  ;;  %v843_v56 = vor.u32 %v951_v54, %v842_v53  ;;  %v967_v57 = vld [vmem:[#allocation9 + $0xc4] sm:$0xf0]  ;;  %s664_s25 = sshll.u32 %s324_s24, 4  ;;  %s665_s25 = int_to_ptr.vmem [resolvable:$true] %s664_s25 }
  0x3a   : > { %v950_v58 = vld [vmem:[#allocation9 + $0x44] sm:$0xf]  ;;  %v844_v59 = vld [vmem:[#allocation9 + $0x48] sm:$0xf0]  ;;  %v907_v60 = vor.u32 %v967_v57, %v906_v55  ;;  %v949_v2 = vld [vmem:[#allocation9 + $0x34] sm:$0xf0] }
  0x3b   : > { %v346_v7 = vmul.f32 %v1072_v4, %v345_v6  ;;  %596 = vmatpush.bf16.msra.mxu0 %v851_v44  ;;  %v847_v61 = vor.u32 %v950_v58, %v844_v59  ;;  %v966_v62 = vld [vmem:[#allocation9 + $0xc4] sm:$0xf]  ;;  %v908_v63 = vld [vmem:[#allocation9 + $0xc8] sm:$0xf0]  ;;  %v898_v3 = vld [vmem:[#allocation9 + $0xb0] sm:$0xf] }
  0x3c   : > { %609 = vmatpush.bf16.msra.mxu1 %v915_v48  ;;  %622 = vmatpush.bf16.msra.mxu2 %v855_v49  ;;  %v965_v5 = vld [vmem:[#allocation9 + $0xb4] sm:$0xf0]  ;;  %v948_v6 = vld [vmem:[#allocation9 + $0x34] sm:$0xf]  ;;  %v947_v17 = vld [vmem:[#allocation9 + $0x24] sm:$0xf0] }
  0x3d   : > { %v347_v8 = vadd.f32 %v1072_v4, %v346_v7  ;;  %635 = vmatpush.bf16.msra.mxu3 %v919_v52  ;;  %v836_v7 = vld [vmem:[#allocation9 + $0x38] sm:$0xf0]  ;;  %v890_v18 = vld [vmem:[#allocation9 + $0xa0] sm:$0xf]  ;;  %v963_v20 = vld [vmem:[#allocation9 + $0xa4] sm:$0xf0] }
  0x3e   : > { %v946_v21 = vld [vmem:[#allocation9 + $0x24] sm:$0xf]  ;;  %v828_v22 = vld [vmem:[#allocation9 + $0x28] sm:$0xf0]  ;;  %v891_v23 = vor.u32 %v963_v20, %v890_v18  ;;  %v818_v27 = vld [vmem:[#allocation9 + $0x10] sm:$0xf] }
  0x3f   : > { %v1458_v9 = vsel %vm348_vm0, %v1072_v4, %v347_v8  ;;  %597 = vmatpush.bf16.msra.mxu0 %v843_v56  ;;  %v899_v8 = vor.u32 %v965_v5, %v898_v3  ;;  %v831_v24 = vor.u32 %v946_v21, %v828_v22  ;;  %v962_v25 = vld [vmem:[#allocation9 + $0xa4] sm:$0xf]  ;;  %v892_v26 = vld [vmem:[#allocation9 + $0xa8] sm:$0xf0]  ;;  %v945_v29 = vld [vmem:[#allocation9 + $0x14] sm:$0xf0] }
  0x40   : > { %610 = vmatpush.bf16.msra.mxu1 %v907_v60  ;;  %623 = vmatpush.bf16.msra.mxu2 %v847_v61  ;;  %v895_v28 = vor.u32 %v962_v25, %v892_v26  ;;  %v882_v30 = vld [vmem:[#allocation9 + $0x90] sm:$0xf]  ;;  %v961_v31 = vld [vmem:[#allocation9 + $0x94] sm:$0xf0]  ;;  %v819_v32 = vor.u32 %v945_v29, %v818_v27  ;;  %v944_v34 = vld [vmem:[#allocation9 + $0x14] sm:$0xf] }
  0x41   : > { %v883_v33 = vor.u32 %v961_v31, %v882_v30  ;;  %v820_v35 = vld [vmem:[#allocation9 + $0x18] sm:$0xf0]  ;;  %v960_v36 = vld [vmem:[#allocation9 + $0x94] sm:$0xf]  ;;  %v810_v39 = vld [vmem:[#allocation9] sm:$0xf] }
  0x42   : > { %v823_v37 = vor.u32 %v944_v34, %v820_v35  ;;  %v884_v38 = vld [vmem:[#allocation9 + $0x98] sm:$0xf0]  ;;  %v943_v40 = vld [vmem:[#allocation9 + $0x4] sm:$0xf0]  ;;  %v874_v42 = vld [vmem:[#allocation9 + $0x80] sm:$0xf] }
  0x43   : > { %v887_v41 = vor.u32 %v960_v36, %v884_v38  ;;  %v959_v43 = vld [vmem:[#allocation9 + $0x84] sm:$0xf0]  ;;  %v942_v44 = vld [vmem:[#allocation9 + $0x4] sm:$0xf]  ;;  %v811_v45 = vor.u32 %v943_v40, %v810_v39  ;;  %v812_v46 = vld [vmem:[#allocation9 + $0x8] sm:$0xf0] }
  0x44   : > { %611 = vmatpush.bf16.msra.mxu1 %v899_v8  ;;  %v958_v47 = vld [vmem:[#allocation9 + $0x84] sm:$0xf]  ;;  %v876_v48 = vld [vmem:[#allocation9 + $0x88] sm:$0xf0]  ;;  %v875_v49 = vor.u32 %v959_v43, %v874_v42  ;;  %v815_v50 = vor.u32 %v942_v44, %v812_v46  ;;  %v338_v58 = vld [vmem:[#allocation6] sm:$0x3] }
  0x45   : > { %v879_v51 = vor.u32 %v958_v47, %v876_v48  ;;  %v371_v61 = vperm.slane %v338_v58, 0  ;;  %s666_s30 = sshll.u32 %s662_s13, 4  ;;  %s649_s21 = scalar_lea.sflag [#allocation5], %s1440_s12  ;;  %s667_s30 = int_to_ptr.hbm [resolvable:$true] %s666_s30 }
  0x46   : > { %s1209_s6 = sshra.s32 %s667_s30, 4  ;;  %s1215_s16 = scalar_lea.hbm %s1520_s5, 32  ;;  %s1210_s6 = int_to_ptr.hbm [resolvable:$true] %s1209_s6 }
  0x47   : > { %s1211_s9 = scalar_lea.hbm %s1210_s6, 16  ;;  %p1216_p11 = scmp.lt.s32.totalorder %s1210_s6, %s1520_s5 }
  0x48   : > { %612 = vmatpush.bf16.msra.mxu1 %v891_v23  ;;  %p1212_p1 = scmp.ne.s32.totalorder %s1210_s6, %s1211_s9  ;;  %p1217_p12 = scmp.lt.s32.totalorder %s1215_s16, %s1211_s9 }
  0x4a   : > { %p1213_p4 = pnand %p1212_p1, %p1412_p3  ;;  %p1218_p13 = por %p1217_p12, %p1216_p11 }
  0x4c   : > { %613 = vmatpush.bf16.msra.mxu1 %v883_v33  ;;  %p1214_p8 = pneg %p1213_p4 }
  0x4e   : > { %p1219_p0 = pnand %p1218_p13, %p1214_p8 }
  0x50   : > { %614 = vmatpush.bf16.msra.mxu1 %v875_v49 }
  0xa5   : > { %v342_v10 = vpop.xlane.xlu0 %341 }
  0xa6   : > { %v350_v11 = vmul.f32 %v1458_v9, %v342_v10  ;;  %v839_v10 = vor.u32 %v948_v6, %v836_v7 }
  0xa8   : > { %v1461_v12 = vsub.f32 %v336_v0, %v350_v11  ;;  %v1463_v13 = vsub.f32 %v337_v1, %v350_v11  ;;  %v911_v0 = vor.u32 %v966_v62, %v908_v63  ;;  %v834_v1 = vld [vmem:[#allocation9 + $0x30] sm:$0xf]  ;;  %v964_v11 = vld [vmem:[#allocation9 + $0xb4] sm:$0xf]  ;;  %624 = vmatpush.bf16.msra.mxu2 %v839_v10  ;;  %v372_v62 = vperm.slane %v338_v58, 1 }
  0xa9   : > { %v835_v4 = vor.u32 %v949_v2, %v834_v1 }
  0xaa   : > { %v353_v14 = vmul.f32 %v1461_v12, %v1461_v12  ;;  %v354_v15 = vmul.f32 %v1463_v13, %v1463_v13  ;;  %636 = vmatpush.bf16.msra.mxu3 %v911_v0  ;;  %v339_v0 = vld [vmem:[#allocation8] sm:$0x3] }
  0xab   : > { %598 = vmatpush.bf16.msra.mxu0 %v835_v4  ;;  %v380_v3 = vperm.slane %v339_v0, 0  ;;  %v381_v4 = vperm.slane %v339_v0, 1 }
  0xac   : > { %v355_v16 = vadd.f32 %v354_v15, %v353_v14  ;;  %v900_v14 = vld [vmem:[#allocation9 + $0xb8] sm:$0xf0]  ;;  %625 = vmatpush.bf16.msra.mxu2 %v831_v24 }
  0xad   : > { %v903_v15 = vor.u32 %v964_v11, %v900_v14 }
  0xae   : > { %356 = vadd.xlane.f32.xlu0 %v355_v16  ;;  %v826_v16 = vld [vmem:[#allocation9 + $0x20] sm:$0xf] }
  0xaf   : > { %637 = vmatpush.bf16.msra.mxu3 %v903_v15  ;;  %v827_v19 = vor.u32 %v947_v17, %v826_v16  ;;  %v421_v17 = vld [vmem:[%s1519_s4] sm:$0x3] }
  0xb0   : > { %626 = vmatpush.bf16.msra.mxu2 %v823_v37  ;;  %v424_v21 = vperm.slane %v421_v17, 1 }
  0xb1   : > { %599 = vmatpush.bf16.msra.mxu0 %v827_v19 }
  0xb3   : > { %638 = vmatpush.bf16.msra.mxu3 %v895_v28 }
  0xb4   : > { %627 = vmatpush.bf16.msra.mxu2 %v815_v50 }
  0xb5   : > { %600 = vmatpush.bf16.msra.mxu0 %v819_v32 }
  0xb7   : > { %639 = vmatpush.bf16.msra.mxu3 %v887_v41 }
  0xb9   : > { %601 = vmatpush.bf16.msra.mxu0 %v811_v45 }
  0xbb   : > { %640 = vmatpush.bf16.msra.mxu3 %v879_v51 }
 0x121   : > { %v357_v52 = vpop.xlane.xlu0 %356 }
 0x122   : > { %v358_v53 = vmul.f32 %v357_v52, %v1458_v9 }
 0x124   : > { %v359_v54 = vadd.f32 1e-05, %v358_v53 }
 0x126   : > { %1073 = vrsqrt.f32 %v359_v54  ;;  %vm366_vm2 = vweird.f32 %v359_v54 }
 0x12c   : > { %v1074_v55 = vpop.eup %1073 }
 0x12d   : > { %v361_v56 = vmul.f32 %v1074_v55, %v359_v54  ;;  %vm367_vm1 = vweird.f32 %v1074_v55 }
 0x12e   : > { %vm368_vm3 = vmor %vm366_vm2, %vm367_vm1 }
 0x12f   : > { %v362_v57 = vmul.f32 %v1074_v55, %v361_v56 }
 0x131   : > { %v363_v59 = vmul.f32 0.5, %v362_v57 }
 0x133   : > { %v364_v60 = vsub.f32 1.5, %v363_v59 }
 0x135   : > { %v365_v63 = vmul.f32 %v1074_v55, %v364_v60 }
 0x137   : > { %v369_v1 = vsel %vm368_vm3, %v1074_v55, %v365_v63 }
 0x138   : > { %v375_v9 = vmul.f32 %v371_v61, %v369_v1  ;;  %v376_v2 = vmul.f32 %v372_v62, %v369_v1 }
 0x13a   : > { %v377_v5 = vmul.f32 %v375_v9, %v1461_v12  ;;  %v378_v6 = vmul.f32 %v376_v2, %v1463_v13  ;;  %v423_v12 = vperm.slane %v421_v17, 0 }
 0x13c   : > { %v384_v7 = vadd.f32 %v380_v3, %v377_v5  ;;  %v385_v8 = vadd.f32 %v381_v4, %v378_v6 }
 0x13e   : > { %v386_v10 = vpack.c.bf16 %v385_v8, %v384_v7 }
 0x140   : > { %v428_v11 = vunpack.c.l.b16 %v386_v10  ;;  %v429_v14 = vunpack.c.h.b16 %v386_v10 }
 0x142   : > { %v430_v15 = vpack.c.b16 %v428_v11, %v428_v11  ;;  %v431_v16 = vpack.c.b16 %v429_v14, %v429_v14 }
 0x144   : > { %602 = vmatmul.bf16.vlgmr.msra.gmra.mxu0 %v430_v15  ;;  %615 = vmatmul.bf16.vlgmr.msra.gmra.mxu1 %v431_v16 }
 0x145   : > { %628 = vmatmul.bf16.vlgmr.msra.gmra.mxu2 %v430_v15  ;;  %641 = vmatmul.bf16.vlgmr.msra.gmra.mxu3 %v431_v16 }
 0x1c1   : > { %v603_v18 = vpop.f32.mrf.mxu0  ;;  %v616_v13 = vpop.f32.mrf.mxu1 }
 0x1c2   : > { %v604_v19 = vadd.f32 %v603_v18, %v423_v12 }
 0x1c4   : > { %v617_v20 = vadd.f32 %v616_v13, %v604_v19 }
 0x1c6   : > { %646 = vst [vmem:[%s324_s24] sm:$0xff] %v617_v20 }
 0x1c8   : > { %v629_v22 = vpop.f32.mrf.mxu2  ;;  %v642_v23 = vpop.f32.mrf.mxu3 }
 0x1c9   : > { %v630_v24 = vadd.f32 %v629_v22, %v424_v21  ;;  %v605_v25 = vpop.f32.mrf.mxu0  ;;  %v618_v26 = vpop.f32.mrf.mxu1 }
 0x1cb   : > { %v643_v27 = vadd.f32 %v642_v23, %v630_v24 }
 0x1cd   : > { %647 = vst [vmem:[%s324_s24 + $0x8] sm:$0xff] %v643_v27 }
 0x1ce   : > { %1222 = shalt.err (!%p1219_p0)
}
 0x1cf   : > { %989 = dma.vmem_to_hbm [thread:$0]  (%p1412_p3), %s665_s25, 256, %s667_s30, %s649_s21  }
 0x1d0   : > { %v631_v28 = vpop.f32.mrf.mxu2  ;;  %v644_v29 = vpop.f32.mrf.mxu3 }
 0x1d1 PF: > { %s678_s12 = sand.u32 1, %s1265_s18   ;;  %p1006_p5 = pnand %p798_p9, %p1372_p6 }
 0x1d2   : > { %s679_s26 = scalar_lea.sflag [#allocation5], %s678_s12 }
 0x1d3   : > { %p1007_p7 = pneg %p1006_p5 }
 0x1d5   : > { %1260 = dma.done.wait (%p1007_p7), %s679_s26, 256  }
 0x1d6   : > { %1262 = vsyncadd (%p1007_p7), %s679_s26, 4294967040  ;;  %s23_s23 = sadd.s32 1, %s1285_s23   ;;  %s1531_s18 = smov %s1269_s19 }
 0x1d7   : > { %p20_p10 = scmp.ge.s32.totalorder %s23_s23, 4   ;;  %s1532_s19 = smov %s1273_s20 }
 0x1d8   : > { %s1533_s20 = smov %s1428_s27  ;;  %s1534_s21 = smov %s1281_s22 }
 0x1d9   : > { %s1535_s22 = smov %s1537_s15  ;;  %22 = sbr.rel (!%p20_p10) target bundleno = 10 (0xa), region = 105 }
 0x1de   :  { %685 = vsyncpa [#allocation4], 1 }
 0x1df   :  { %687 = vsyncpa [#allocation4 + $0x1], 1 }
 0x1e0   :  { %688 = vsyncpa [#allocation7], 1 }
 0x1e1   :  { %689 = vsyncpa [#allocation10], 1 }
 0x1e2   :  { %690 = vsyncpa [#allocation5], 1 }
 0x1e3   :  { %692 = vsyncpa [#allocation5 + $0x1], 1 }

</bundles_post_ra>
